<compile_context>
chip_gen: v7x
topology: tpu7x:2x2x1
jax: 0.10.0
libtpu: 0.0.40
codegen_flags: <defaults>
</compile_context>

<pallas_src>
import math
from functools import partial

import jax
import jax.numpy as jnp
from jax.experimental import pallas as pl
from jax.experimental.pallas import tpu as pltpu


def _round_up(x, m):
    return (x + m - 1) // m * m


def _pick_tile(dim, requested, align):
    """Largest tile <= requested (multiple of `align`) dividing the aligned dim.

    Returns (tile, padded_dim). Choosing a divisor of the aligned dim avoids
    over-padding (extra MXU passes + extra DMA bytes) while keeping
    vreg/MXU-friendly alignment.
    """
    dim_a = _round_up(max(dim, 1), align)
    req = max(align, (requested // align) * align)
    if dim_a <= req:
        return dim_a, dim_a
    t = req
    while t >= align:
        if dim_a % t == 0:
            return t, dim_a
        t -= align
    return align, dim_a


def _vmem_budget_bytes():
    """Generation-aware VMEM budget (physical capacity minus ~25% headroom)."""
    cap = 64 << 20  # conservative fallback (v7x per-TC capacity)
    try:
        info = pltpu.get_tpu_info()
        cap = int(getattr(info, "vmem_capacity_bytes", cap))
    except Exception:
        pass
    return (cap * 3) // 4


# ----------------------------- kernels --------------------------------------


def _kernel_resident(x_ref, w_ref, b_ref, o_ref, *, precision):
    # Full weight is VMEM-resident (constant index_map); single dot per M tile.
    acc = jnp.dot(x_ref[...], w_ref[...],
                  preferred_element_type=jnp.float32, precision=precision)
    o_ref[...] = jnp.maximum(acc + b_ref[...], 0.0).astype(o_ref.dtype)


def _kernel_tiled_inplace(x_ref, w_ref, b_ref, o_ref, *, precision):
    # f32 output: accumulate directly into the k-resident output block
    # (saves the tm*tn*4 scratch and one VMEM->VMEM copy per (i, j) tile).
    k = pl.program_id(2)

    @pl.when(k == 0)
    def _init():
        o_ref[...] = jnp.zeros_like(o_ref)

    o_ref[...] += jnp.dot(x_ref[...], w_ref[...],
                          preferred_element_type=jnp.float32, precision=precision)

    @pl.when(k == pl.num_programs(2) - 1)
    def _finalize():
        o_ref[...] = jnp.maximum(o_ref[...] + b_ref[...], 0.0)


def _kernel_tiled_acc(x_ref, w_ref, b_ref, o_ref, acc_ref, *, precision):
    # Non-f32 output: keep a float32 VMEM accumulator, cast only at the store.
    k = pl.program_id(2)

    @pl.when(k == 0)
    def _init():
        acc_ref[...] = jnp.zeros_like(acc_ref)

    acc_ref[...] += jnp.dot(x_ref[...], w_ref[...],
                            preferred_element_type=jnp.float32, precision=precision)

    @pl.when(k == pl.num_programs(2) - 1)
    def _finalize():
        o_ref[...] = jnp.maximum(acc_ref[...] + b_ref[...], 0.0).astype(o_ref.dtype)


# ----------------------------- wrapper ---------------------------------------


def mlp_layer(x, weight_t, bias, *, tm=512, tn=512, tk=512,
              matmul_dtype=jnp.bfloat16, precision=None,
              max_weight_resident_bytes=None):
    """Pallas implementation of MLPLayer.forward: relu(x @ W^T + b).

    x            : [..., K]
    weight_t     : [K, N]  (PyTorch's [out, in] weight, transposed)
    bias         : [N]
    matmul_dtype : dtype fed to the MXU. Default bf16 (f32 accumulation + f32
                   bias/ReLU epilogue, expected |err| ~ 1e-2 relative). Pass
                   jnp.float32 (optionally precision=lax.Precision.HIGHEST)
                   for full-f32 fidelity with the PyTorch forward.
    """
    K, N = weight_t.shape
    lead = x.shape[:-1]
    x2 = x.reshape(-1, K)
    M = x2.shape[0]

    out_dtype = x.dtype
    mm_dtype = jnp.dtype(matmul_dtype)
    mm_bytes = mm_dtype.itemsize
    out_bytes = jnp.dtype(out_dtype).itemsize
    # Sublane packing: 8 rows (f32), 16 (bf16), 32 (fp8/int8).
    m_align = max(8, 32 // mm_bytes)

    tm, Mp = _pick_tile(M, tm, m_align)
    tk, Kp = _pick_tile(K, tk, 128)
    tn, Np = _pick_tile(N, tn, 128)

    budget = _vmem_budget_bytes()

    # ---- choose weight-resident fast path vs generic tiled path ------------
    weight_bytes = Kp * Np * mm_bytes
    resident_est = (
        2 * weight_bytes            # full weight (conservatively count 2 bufs)
        + 2 * tm * Kp * mm_bytes    # double-buffered x tile
        + 2 * tm * Np * out_bytes   # double-buffered out tile
        + 2 * Np * 4                # bias
    )
    resident_cap = budget if max_weight_resident_bytes is None else max_weight_resident_bytes
    use_resident = (weight_bytes <= resident_cap) and (resident_est <= budget)

    if use_resident:
        # Weight DMA'd once (constant index_map) and kept resident in VMEM;
        # grid iterates only over M tiles -> zero weight re-streaming.
        grid = (Mp // tm,)
        kernel = partial(_kernel_resident, precision=precision)
        in_specs = [
            pl.BlockSpec((tm, Kp), lambda i: (i, 0)),   # x tile
            pl.BlockSpec((Kp, Np), lambda i: (0, 0)),   # full weight (resident)
            pl.BlockSpec((1, Np), lambda i: (0, 0)),    # bias (f32)
        ]
        out_specs = pl.BlockSpec((tm, Np), lambda i: (i, 0))
        scratch_shapes = []
        dim_sem = ("parallel",)
        vmem_est = resident_est
        bytes_accessed = (M * K + K * N) * mm_bytes + N * 4 + M * N * out_bytes
    else:
        gm, gn, gk = Mp // tm, Np // tn, Kp // tk
        in_place = jnp.dtype(out_dtype) == jnp.dtype(jnp.float32)
        if in_place:
            kernel = partial(_kernel_tiled_inplace, precision=precision)
            scratch_shapes = []
            acc_bytes = 0
        else:
            kernel = partial(_kernel_tiled_acc, precision=precision)
            scratch_shapes = [pltpu.VMEM((tm, tn), jnp.float32)]
            acc_bytes = tm * tn * 4

        if gm == 1 and gn > 1:
            # Megacore (v7x): make the leading parallel axis the one with
            # >= 2 blocks so both TensorCores get work for decode-sized M.
            grid = (gn, gm, gk)
            x_map = lambda j, i, k: (i, k)
            w_map = lambda j, i, k: (k, j)
            b_map = lambda j, i, k: (0, j)
            o_map = lambda j, i, k: (i, j)
        else:
            grid = (gm, gn, gk)
            x_map = lambda i, j, k: (i, k)
            w_map = lambda i, j, k: (k, j)
            b_map = lambda i, j, k: (0, j)
            o_map = lambda i, j, k: (i, j)

        in_specs = [
            pl.BlockSpec((tm, tk), x_map),   # x tile
            pl.BlockSpec((tk, tn), w_map),   # weight tile
            pl.BlockSpec((1, tn), b_map),    # bias tile (f32)
        ]
        out_specs = pl.BlockSpec((tm, tn), o_map)
        dim_sem = ("parallel", "parallel", "arbitrary")
        vmem_est = (2 * tm * tk * mm_bytes + 2 * tk * tn * mm_bytes
                    + 2 * tn * 4 + 2 * tm * tn * out_bytes + acc_bytes)
        # Actual streamed traffic including tile re-use factors.
        bytes_accessed = (gn * Mp * Kp * mm_bytes + gm * Kp * Np * mm_bytes
                          + gm * Np * 4 + Mp * Np * out_bytes)

    vmem_limit = int(min(max(2 * vmem_est, 32 << 20), budget))

    # ---- pad / cast only when statically necessary --------------------------
    # NOTE: the weight/bias prep is static w.r.t. the model; in a real network
    # hoist w_p / b_p out of the per-call path (prepare once, reuse every call).
    def _prep(a, pad_rows, pad_cols, dtype):
        if pad_rows or pad_cols:
            a = jnp.pad(a, ((0, pad_rows), (0, pad_cols)))
        if a.dtype != dtype:
            a = a.astype(dtype)
        return a

    x_p = _prep(x2, Mp - M, Kp - K, mm_dtype)
    w_p = _prep(weight_t, Kp - K, Np - N, mm_dtype)
    b_p = bias.astype(jnp.float32)
    if Np != N:
        b_p = jnp.pad(b_p, (0, Np - N))
    b_p = b_p.reshape(1, Np)

    cost = pl.CostEstimate(
        flops=2 * M * K * N,
        transcendentals=0,
        bytes_accessed=int(bytes_accessed),
    )

    out = pl.pallas_call(
        kernel,
        out_shape=jax.ShapeDtypeStruct((Mp, Np), out_dtype),
        grid_spec=pltpu.PrefetchScalarGridSpec(
            num_scalar_prefetch=0,
            grid=grid,
            in_specs=in_specs,
            out_specs=out_specs,
            scratch_shapes=scratch_shapes,
        ),
        compiler_params=pltpu.CompilerParams(
            dimension_semantics=dim_sem,
            vmem_limit_bytes=vmem_limit,
        ),
        cost_estimate=cost,
    )(x_p, w_p, b_p)

    if Mp != M or Np != N:
        out = out[:M, :N]
    return out.reshape(*lead, N)


def init_mlp_params(key, in_features, out_features, is_first=False):
    """Deterministic parameter init matching MLPLayer.init_weights semantics."""
    kw, kb = jax.random.split(key)
    if is_first:
        bound_w = 1.0 / in_features                        # uniform_(-1/in, 1/in)
    else:
        gain = math.sqrt(2.0)                              # calculate_gain('relu')
        bound_w = gain * math.sqrt(6.0 / (in_features + out_features))  # xavier_uniform_
    # PyTorch layout is [out, in]; store transposed [in, out] for the kernel.
    weight = jax.random.uniform(
        kw, (out_features, in_features), jnp.float32, -bound_w, bound_w
    )
    weight_t = weight.T
    # nn.Linear default bias init: U(-1/sqrt(fan_in), 1/sqrt(fan_in))
    bound_b = 1.0 / math.sqrt(in_features)
    bias = jax.random.uniform(kb, (out_features,), jnp.float32, -bound_b, bound_b)
    return weight_t, bias


if __name__ == "__main__":
    key = jax.random.PRNGKey(0)
    k_x, k_p, k_x2, k_p2 = jax.random.split(key, 4)

    # ---- small shape consistent with the module (batch=2, seq=8, hidden=32) ----
    batch, seq, in_features, out_features = 2, 8, 32, 32
    x = jax.random.normal(k_x, (batch, seq, in_features), jnp.float32)
    weight_t, bias = init_mlp_params(k_p, in_features, out_features, is_first=False)
    ref = jnp.maximum(jnp.einsum("bsk,kn->bsn", x, weight_t) + bias, 0.0)

    # Default path: bf16 MXU operands, f32 accumulation + f32 bias/ReLU epilogue,
    # weight-resident fast path (weight fits VMEM).
    out = jax.block_until_ready(mlp_layer(x, weight_t, bias))
    assert out.shape == (batch, seq, out_features)
    assert jnp.allclose(out, ref, atol=3e-2, rtol=3e-2)

    # Full-f32 MXU path (tight tolerance vs the PyTorch-style f32 reference).
    out_f32 = jax.block_until_ready(
        mlp_layer(x, weight_t, bias, matmul_dtype=jnp.float32)
    )
    assert jnp.allclose(out_f32, ref, atol=1e-5, rtol=1e-5)

    # ---- ragged shape: exercises padding, the tiled (non-resident) path with
    #      k-axis accumulation into o_ref, and the megacore grid swap (gm==1). ----
    b2, s2, k2, n2 = 3, 50, 300, 200
    x_big = jax.random.normal(k_x2, (b2, s2, k2), jnp.float32)
    w_big, bias_big = init_mlp_params(k_p2, k2, n2, is_first=False)
    ref_big = jnp.maximum(jnp.einsum("bsk,kn->bsn", x_big, w_big) + bias_big, 0.0)

    out_big = jax.block_until_ready(
        mlp_layer(x_big, w_big, bias_big, matmul_dtype=jnp.float32,
                  tn=128, tk=128, max_weight_resident_bytes=0)
    )
    assert out_big.shape == (b2, s2, n2)
    assert jnp.allclose(out_big, ref_big, atol=1e-4, rtol=1e-4)

    # Tiled path with the f32 scratch-accumulator variant (bf16 in/out).
    out_big_bf16 = jax.block_until_ready(
        mlp_layer(x_big.astype(jnp.bfloat16), w_big, bias_big,
                  tm=64, tn=128, tk=128, max_weight_resident_bytes=0)
    )
    assert out_big_bf16.dtype == jnp.bfloat16
    assert jnp.allclose(out_big_bf16.astype(jnp.float32), ref_big,
                        atol=2e-1, rtol=5e-2)

    print("KERNEL_OK")
</pallas_src>

<mosaic_0001>
module attributes {stable_mosaic.version = 11 : i64} {
  func.func @_kernel_resident(%arg0: i32, %arg1: memref<16x128xbf16, #tpu.memory_space<vmem>>, %arg2: memref<128x128xbf16, #tpu.memory_space<vmem>>, %arg3: memref<1x128xf32, #tpu.memory_space<vmem>>, %arg4: memref<16x128xf32, #tpu.memory_space<vmem>>) attributes {dimension_semantics = [#tpu.dimension_semantics<parallel>], iteration_bounds = array<i64: 1>, scalar_prefetch = 0 : i64, scratch_operands = 0 : i64, tpu.core_type = #tpu.core_type<tc>, window_params = [{transform_indices = @transform_0, window_bounds = array<i64: 16, 128>}, {pipeline_mode = #tpu.pipeline_mode<synchronous>, transform_indices = @transform_1, window_bounds = array<i64: 128, 128>}, {pipeline_mode = #tpu.pipeline_mode<synchronous>, transform_indices = @transform_2, window_bounds = array<i64: 1, 128>}, {transform_indices = @transform_3, window_bounds = array<i64: 16, 128>}]} {
    %c0 = arith.constant 0 : index
    %c0_0 = arith.constant 0 : index
    %0 = vector.load %arg1[%c0, %c0_0] : memref<16x128xbf16, #tpu.memory_space<vmem>>, vector<16x128xbf16>
    %c0_1 = arith.constant 0 : index
    %c0_2 = arith.constant 0 : index
    %1 = vector.load %arg2[%c0_1, %c0_2] : memref<128x128xbf16, #tpu.memory_space<vmem>>, vector<128x128xbf16>
    %cst = arith.constant dense<0.000000e+00> : vector<16x128xf32>
    %2 = tpu.matmul %0, %1, %cst {dimension_numbers = #tpu.dot_dimension_numbers<[1], [0], [0], [1], [0, 0, 1, 1], [], []>} : vector<16x128xbf16>, vector<128x128xbf16>, vector<16x128xf32> -> vector<16x128xf32>
    %c0_3 = arith.constant 0 : index
    %c0_4 = arith.constant 0 : index
    %3 = vector.load %arg3[%c0_3, %c0_4] : memref<1x128xf32, #tpu.memory_space<vmem>>, vector<1x128xf32>
    %4 = vector.broadcast %3 : vector<1x128xf32> to vector<16x128xf32>
    %5 = arith.addf %2, %4 : vector<16x128xf32>
    %cst_5 = arith.constant 0.000000e+00 : f32
    %6 = vector.broadcast %cst_5 : f32 to vector<16x128xf32>
    %7 = arith.maximumf %5, %6 : vector<16x128xf32>
    %c0_6 = arith.constant 0 : index
    %c0_7 = arith.constant 0 : index
    %8 = vector.load %arg4[%c0_6, %c0_7] : memref<16x128xf32, #tpu.memory_space<vmem>>, vector<16x128xf32>
    tpu.vector_store %arg4[%c0_6, %c0_7], %7 {strides = array<i32>} : memref<16x128xf32, #tpu.memory_space<vmem>>, vector<16x128xf32>,
    return
  }
  func.func @transform_0(%arg0: i32) -> (i32, i32) {
    %c0_i32 = arith.constant 0 : i32
    %c0_i32_0 = arith.constant 0 : i32
    return %arg0, %c0_i32 : i32, i32
  }
  func.func @transform_1(%arg0: i32) -> (i32, i32) {
    %c0_i32 = arith.constant 0 : i32
    %c0_i32_0 = arith.constant 0 : i32
    %c0_i32_1 = arith.constant 0 : i32
    return %c0_i32, %c0_i32_0 : i32, i32
  }
  func.func @transform_2(%arg0: i32) -> (i32, i32) {
    %c0_i32 = arith.constant 0 : i32
    %c0_i32_0 = arith.constant 0 : i32
    %c0_i32_1 = arith.constant 0 : i32
    return %c0_i32, %c0_i32_0 : i32, i32
  }
  func.func @transform_3(%arg0: i32) -> (i32, i32) {
    %c0_i32 = arith.constant 0 : i32
    %c0_i32_0 = arith.constant 0 : i32
    return %arg0, %c0_i32 : i32, i32
  }
}

</mosaic_0001>

<bundles_post_ra>
// kernel: tpu_custom_call.1
= control target key start
LH: loop header
LB: loop body
LE: loop exit
PB: predicated region body
PF: predicated region fallthrough
CT: control target
= control target key end

     0   :  { %8 = vsyncpa [#allocation3], 0  ;;  %s383_s0 = inlined_call_operand.hbm [shape: bf16[16,128], index: 0, kind: input, shape index: {}]   ;;  %s384_s1 = inlined_call_operand.hbm [shape: bf16[128,128], index: 1, kind: input, shape index: {}]   ;;  %s385_s2 = inlined_call_operand.vmem [shape: f32[1,128], index: 2, kind: input, shape index: {}]   ;;  %s386_s3 = inlined_call_operand.hbm [shape: f32[16,128], index: 3, kind: output, shape index: {}]  }
   0x1   :  { %9 = vsyncpa [#allocation6], 0 }
   0x2   :  { %10 = vsyncpa [#allocation4], 0  ;;  %s315_s12 = smov [#allocation2]   ;;  %s243_s16 = scalar_lea.hbm %s383_s0, 128 }
   0x3   :  { %s16_s13 = sshll.u32 %s315_s12, 4  ;;  %p244_p0 = scmp.ne.s32.totalorder %s383_s0, %s243_s16  ;;  %s17_s13 = int_to_ptr.vmem [resolvable:$true] %s16_s13 }
   0x4   :  { %p247_p1 = scmp.lt.u32.totalorder %s243_s16, %s383_s0 }
   0x6   :  { %p249_p2 = pnand %p247_p1, %p244_p0 }
   0x8   :  { %252 = shalt.err (!%p249_p2)
}
   0x9   :  { %s253_s21 = scalar_lea.vmem %s17_s13, 128  ;;  %p258_p4 = scmp.lt.s32.totalorder %s17_s13, %s17_s13 }
   0xa   :  { %p254_p3 = scmp.ne.s32.totalorder %s17_s13, %s253_s21  ;;  %p259_p5 = scmp.lt.s32.totalorder %s253_s21, %s253_s21 }
   0xc   :  { %p260_p6 = por %p259_p5, %p258_p4 }
   0xe   :  { %p261_p7 = pnand %p260_p6, %p254_p3 }
  0x10   :  { %264 = shalt.err (!%p261_p7)
}
  0x11   :  { %s316_s22 = smov 64   ;;  %s317_s23 = smov 4  }
  0x12   :  { %22 = dma.hbm_to_vmem [thread:$0]  %s383_s0, 128, %s17_s13, [#allocation3], %s316_s22, %s316_s22, %s317_s23  }
  0x13   :  { %s318_s26 = smov [#allocation5]   ;;  %s265_s30 = scalar_lea.hbm %s384_s1, 1024 }
  0x14   :  { %s28_s27 = sshll.u32 %s318_s26, 4  ;;  %p266_p8 = scmp.ne.s32.totalorder %s384_s1, %s265_s30  ;;  %s29_s27 = int_to_ptr.vmem [resolvable:$true] %s28_s27 }
  0x15   :  { %p269_p9 = scmp.lt.u32.totalorder %s265_s30, %s384_s1 }
  0x17   :  { %p271_p10 = pnand %p269_p9, %p266_p8 }
  0x19   :  { %274 = shalt.err (!%p271_p10)
}
  0x1a   :  { %s275_s8 = scalar_lea.vmem %s29_s27, 1024  ;;  %p280_p12 = scmp.lt.s32.totalorder %s29_s27, %s29_s27 }
  0x1b   :  { %p276_p11 = scmp.ne.s32.totalorder %s29_s27, %s275_s8  ;;  %p281_p13 = scmp.lt.s32.totalorder %s275_s8, %s275_s8 }
  0x1d   :  { %p282_p0 = por %p281_p13, %p280_p12 }
  0x1f   :  { %p283_p1 = pnand %p282_p0, %p276_p11 }
  0x21   :  { %286 = shalt.err (!%p283_p1)
}
  0x22   :  { %34 = dma.hbm_to_vmem [thread:$0]  %s384_s1, 1024, %s29_s27, [#allocation6], %s316_s22, %s316_s22, %s317_s23  }
  0x23   :  { %309 = dma.done.wait [#allocation3], 128  }
  0x24   :  { %310 = vsyncadd [#allocation3], 4294967168 }
  0x25   :  { %311 = dma.done.wait [#allocation6], 1024  }
  0x26   :  { %312 = vsyncadd [#allocation6], 4294966272  ;;  %v319_v0 = vmov 0.0   ;;  %vm320_vm0 = vmmov 0   ;;  %v234_v1 = vld [vmem:[#allocation5] sm:$0xff]   ;;  %v235_v2 = vld [vmem:[#allocation5 + $0x8] sm:$0xff]  }
  0x27   :  { %205 = vmatprep.subr.bf16.mxu0 %v319_v0  ;;  %221 = vmatprep.mubr.msk.bf16.mxu0 %vm320_vm0, %v319_v0  ;;  %v236_v3 = vld [vmem:[#allocation5 + $0x10] sm:$0xff]   ;;  %v237_v4 = vld [vmem:[#allocation5 + $0x18] sm:$0xff]   ;;  %v238_v5 = vld [vmem:[#allocation5 + $0x20] sm:$0xff]   ;;  %s321_s11 = smov [#allocation7]  }
  0x28   :  { %206 = vmatpush3.bf16.msra.mxu0 %v234_v1  ;;  %v239_v6 = vld [vmem:[#allocation5 + $0x28] sm:$0xff]   ;;  %v240_v7 = vld [vmem:[#allocation5 + $0x30] sm:$0xff]   ;;  %v241_v8 = vld [vmem:[#allocation5 + $0x38] sm:$0xff]   ;;  %s173_s12 = sshll.u32 %s321_s11, 4  ;;  %s174_s12 = int_to_ptr.vmem [resolvable:$true] %s173_s12 }
  0x29   :  { %207 = vmatprep.subr.bf16.mxu0 %v319_v0  ;;  %v242_v9 = vld [vmem:[#allocation2] sm:$0xff]   ;;  %s287_s13 = scalar_lea.vmem %s174_s12, 256  ;;  %p292_p3 = scmp.lt.s32.totalorder %s174_s12, %s174_s12 }
  0x2a   :  { %v186_v10 = vld [vmem:[%s385_s2] ss:$0 sm:$0xff]  ;;  %p288_p2 = scmp.ne.s32.totalorder %s174_s12, %s287_s13  ;;  %p293_p4 = scmp.lt.s32.totalorder %s287_s13, %s287_s13 }
  0x2c   :  { %208 = vmatpush3.bf16.msra.mxu0 %v235_v2  ;;  %p294_p5 = por %p293_p4, %p292_p3 }
  0x2d   :  { %209 = vmatprep.subr.bf16.mxu0 %v319_v0 }
  0x2e   :  { %p295_p6 = pnand %p294_p5, %p288_p2 }
  0x30   :  { %210 = vmatpush3.bf16.msra.mxu0 %v236_v3 }
  0x31   :  { %211 = vmatprep.subr.bf16.mxu0 %v319_v0 }
  0x34   :  { %212 = vmatpush3.bf16.msra.mxu0 %v237_v4 }
  0x35   :  { %213 = vmatprep.subr.bf16.mxu0 %v319_v0 }
  0x38   :  { %214 = vmatpush3.bf16.msra.mxu0 %v238_v5 }
  0x39   :  { %215 = vmatprep.subr.bf16.mxu0 %v319_v0 }
  0x3c   :  { %216 = vmatpush3.bf16.msra.mxu0 %v239_v6 }
  0x3d   :  { %217 = vmatprep.subr.bf16.mxu0 %v319_v0 }
  0x40   :  { %218 = vmatpush3.bf16.msra.mxu0 %v240_v7 }
  0x41   :  { %219 = vmatprep.subr.bf16.mxu0 %v319_v0 }
  0x44   :  { %220 = vmatpush3.bf16.msra.mxu0 %v241_v8 }
  0x47   :  { %222 = vmatmul.mubr.bf16.vlgmr.msra.gmra.mrb[0].mxu0 %v242_v9 }
 0x11a   :  { %v157_v11 = vpop.f32.mrb[0].mxu0 }
 0x11b   :  { %v158_v12 = vadd.f32 %v186_v10, %v157_v11  ;;  %v223_v13 = vpop.f32.mrb[1].mxu0 }
 0x11c   :  { %v160_v14 = vpop.f32.mrb[2].mxu0 }
 0x11d   :  { %v164_v15 = vmax.f32 %v158_v12, 0.0  ;;  %v161_v16 = vadd.f32 %v186_v10, %v160_v14  ;;  %v224_v17 = vpop.f32.mrb[3].mxu0 }
 0x11f   :  { %166 = vst [vmem:[#allocation7] sm:$0xff] %v164_v15  ;;  %v165_v18 = vmax.f32 %v161_v16, 0.0 }
 0x121   :  { %167 = vst [vmem:[#allocation7 + $0x8] sm:$0xff] %v165_v18 }
 0x122   :  { %298 = shalt.err (!%p295_p6)
}
 0x123   :  { %s299_s15 = scalar_lea.hbm %s386_s3, 256 }
 0x124   :  { %p300_p7 = scmp.ne.s32.totalorder %s386_s3, %s299_s15  ;;  %p303_p8 = scmp.lt.u32.totalorder %s299_s15, %s386_s3 }
 0x126   :  { %p305_p9 = pnand %p303_p8, %p300_p7 }
 0x128   :  { %308 = shalt.err (!%p305_p9)
}
 0x129   :  { %s322_s20 = smov 128   ;;  %s323_s21 = smov 8  }
 0x12a   :  { %179 = dma.vmem_to_hbm [thread:$0]  %s174_s12, 256, %s386_s3, [#allocation4], %s322_s20, %s322_s20, %s323_s21  }
 0x12b   :  { %313 = dma.done.wait [#allocation4], 256  }
 0x12c   :  { %314 = vsyncadd [#allocation4], 4294967040 }
 0x12d   :  { %183 = vsyncpa [#allocation3], 1 }
 0x12e   :  { %184 = vsyncpa [#allocation6], 1 }
 0x12f   :  { %185 = vsyncpa [#allocation4], 1 }

</bundles_post_ra>
